<compile_context>
chip_gen: v6e
topology: v6e:2x2x1
jax: 0.10.0
libtpu: 0.0.40
codegen_flags: <defaults>
</compile_context>

<pallas_src>
import functools

import jax
import jax.numpy as jnp
from jax.experimental import pallas as pl
from jax.experimental.pallas import tpu as pltpu


def _clip_contrastive_kernel(motion_ref, text_ref, labels_ref, out_ref, acc_ref,
                             *, n_total, tm, blocks_per_part, need_mask):
    # motion_ref / text_ref: (TM, C) logits tile in VMEM
    # labels_ref:            (TM, 1) int32 tile (per-block DMA)
    # out_ref:               (1, 8, 128) f32 per-partition partial (written once)
    # acc_ref:               (1, 1) f32 VMEM scratch accumulator (per partition)
    i = pl.program_id(1)
    nblk = pl.num_programs(1)

    @pl.when(i == 0)
    def _init():
        acc_ref[...] = jnp.zeros_like(acc_ref)

    lm = motion_ref[...].astype(jnp.float32)          # (TM, C)
    lt = text_ref[...].astype(jnp.float32)            # (TM, C)
    c = lm.shape[1]

    # Label mask built once and reused for both matrices (no explicit one-hot
    # materialization, no int->f32 cast, no full-tile multiply).
    lab = labels_ref[...]                                        # (TM, 1) int32
    col = jax.lax.broadcasted_iota(jnp.int32, (tm, c), 1)        # (TM, C)
    lab_mask = col == lab                                        # (TM, C) bool

    if need_mask:
        # Row-validity for padded / ragged tail rows. Global row id is derived
        # from the *unclamped* block index, so re-read (clamped) blocks and
        # garbage tail rows contribute exactly zero.
        p = pl.program_id(0)
        row = (jax.lax.broadcasted_iota(jnp.int32, (tm, 1), 0)
               + (p * blocks_per_part + i) * tm)
        valid = row < n_total                                    # (TM, 1) bool
    else:
        valid = None

    def ce_block_sum(logits):
        # Numerically-stable logsumexp over the class axis.
        m = jnp.max(logits, axis=-1, keepdims=True)              # (TM, 1)
        # TODO(synk): if profiling shows the EUP exp slot binding (bf16 inputs
        # on v6e/v7x at full HBM bw), compute exp in bf16, accumulate in f32.
        lse = m + jnp.log(jnp.sum(jnp.exp(logits - m), axis=-1, keepdims=True))
        correct = jnp.sum(jnp.where(lab_mask, logits, 0.0),
                          axis=-1, keepdims=True)                # (TM, 1)
        per_row = lse - correct                                  # (TM, 1)
        if valid is not None:
            # Must remain a select (NOT a multiply): padded rows may hold
            # NaN/Inf garbage and a multiply would propagate it.
            per_row = jnp.where(valid, per_row, 0.0)
        return jnp.sum(per_row, axis=0, keepdims=True)           # (1, 1)

    acc_ref[...] += ce_block_sum(lm) + ce_block_sum(lt)

    @pl.when(i == nblk - 1)
    def _finalize():
        # Lane-dense output tile; wrapper reads element [p, 0, 0].
        out_ref[...] = jnp.broadcast_to(acc_ref[...].reshape(1, 1, 1),
                                        out_ref.shape)


def _vmem_capacity_bytes():
    try:
        info = pltpu.get_tpu_info()
        cap = getattr(info, "vmem_capacity_bytes", None)
        if cap:
            return int(cap)
    except Exception:
        pass
    return 64 * 1024 * 1024   # conservative fallback (v7x per-TensorCore VMEM)


def _choose_tiling(n, c, itemsize):
    """Derive row tile + scoped-VMEM limit from the generation's VMEM capacity."""
    vmem_cap = _vmem_capacity_bytes()
    # ~48 MiB on v7x (64 MiB physical), ~96 MiB on v5e/v6e (128 MiB physical).
    vmem_limit = max(32 << 20, min((vmem_cap * 3) // 4, 96 << 20))
    # Per-row VMEM footprint of one (TM, C) tile:
    #   2 logits x 2 pipeline buffers (input dtype)
    # + ~4 full-tile f32 temporaries (upcast, exp, masked-correct, mask)
    # + 2 label buffers (int32, lane-padded to 128 -> 512 B/row).
    per_row = c * (4 * itemsize + 16) + 1024
    tm_budget = (vmem_limit - (1 << 20)) // per_row   # 1 MiB headroom (scratch etc.)
    # HBM-roofline sweet spot: ~4 MiB per input tile per pipeline buffer.
    tm_target = (4 << 20) // (c * itemsize)
    tm = min(tm_budget, tm_target)
    # Sanity cap: beyond this, the lane-padded labels buffers (512 B/row)
    # dominate for tiny C and per-tile bytes are already far past the sweet spot.
    tm = min(tm, 16384)
    tm = max(8, (int(tm) // 8) * 8)
    if tm >= n:
        tm = n
    return tm, int(vmem_limit)


def clip_contrastive_loss(logits_per_motion, logits_per_text, labels,
                          block_rows=None):
    """Pallas TPU implementation of Clip_ContrastiveLoss.forward.

    Args:
      logits_per_motion: [N, C] float array (f32 or bf16; upcast in-kernel).
      logits_per_text:   [N, C] float array.
      labels:            [N] integer class indices in [0, C).
      block_rows:        optional row-tile override (rounded to a multiple of 8).
    Returns:
      scalar float32 loss.
    """
    n, c = logits_per_motion.shape
    assert logits_per_text.shape == (n, c)
    if n == 0:
        return jnp.float32(0.0)
    itemsize = jnp.dtype(logits_per_motion.dtype).itemsize

    auto_tm, vmem_limit = _choose_tiling(n, c, itemsize)
    if block_rows is None:
        tm = auto_tm
    else:
        tm = int(block_rows)
        tm = n if tm >= n else max(8, (tm // 8) * 8)

    total_blocks = pl.cdiv(n, tm)
    # Leading "parallel" partition axis: lets v7x's 2 TensorCores split the row
    # range; on single-TC chips (v5e/v6e) the same blocks just run serially.
    num_parts = 2 if total_blocks >= 2 else 1
    blocks_per_part = pl.cdiv(total_blocks, num_parts)
    n_blocks_padded = num_parts * blocks_per_part
    rows_padded = n_blocks_padded * tm
    need_mask = rows_padded != n

    labels2d = labels.astype(jnp.int32).reshape(n, 1)
    if rows_padded != n:
        labels2d = jnp.pad(labels2d, ((0, rows_padded - n), (0, 0)))

    def logits_index_map(p, i):
        blk = p * blocks_per_part + i
        # Clamp so a fully-padded trailing block never issues an out-of-bounds
        # DMA (its rows are masked out in-kernel via the unclamped row id).
        return (jnp.minimum(blk, total_blocks - 1), 0)

    def labels_index_map(p, i):
        return (p * blocks_per_part + i, 0)   # labels padded -> always in bounds

    kernel = functools.partial(
        _clip_contrastive_kernel, n_total=n, tm=tm,
        blocks_per_part=blocks_per_part, need_mask=need_mask)

    partials = pl.pallas_call(
        kernel,
        out_shape=jax.ShapeDtypeStruct((num_parts, 8, 128), jnp.float32),
        grid_spec=pltpu.PrefetchScalarGridSpec(
            num_scalar_prefetch=0,
            grid=(num_parts, blocks_per_part),
            in_specs=[
                pl.BlockSpec((tm, c), logits_index_map),
                pl.BlockSpec((tm, c), logits_index_map),
                pl.BlockSpec((tm, 1), labels_index_map),
            ],
            out_specs=pl.BlockSpec((1, 8, 128), lambda p, i: (p, 0, 0)),
            scratch_shapes=[pltpu.VMEM((1, 1), jnp.float32)],
        ),
        compiler_params=pltpu.CompilerParams(
            # Partition axis parallel (megacore); shared accumulator along the
            # row-block axis -> "arbitrary".
            dimension_semantics=("parallel", "arbitrary"),
            vmem_limit_bytes=vmem_limit,
        ),
    )(logits_per_motion, logits_per_text, labels2d)

    # Sum per-partition partials in the wrapper, then mean over rows and
    # average the two cross-entropies.
    return jnp.sum(partials[:, 0, 0]) * jnp.float32(0.5 / n)


def _reference_loss(lm, lt, labels):
    # plain-JAX reference for a sanity check
    def ce(logits, y):
        logits = logits.astype(jnp.float32)
        logz = jax.nn.logsumexp(logits, axis=-1)
        correct = jnp.take_along_axis(logits, y[:, None], axis=-1)[:, 0]
        return jnp.mean(logz - correct)
    return (ce(lm, labels) + ce(lt, labels)) * 0.5


if __name__ == "__main__":
    key = jax.random.PRNGKey(0)
    k1, k2, k3, k4, k5, k6 = jax.random.split(key, 6)

    # Case 1: CLIP-style square similarity matrix, labels = arange(batch).
    batch = 8
    logits_per_motion = jax.random.normal(k1, (batch, batch), jnp.float32) * 3.0
    logits_per_text = logits_per_motion.T + 0.1 * jax.random.normal(
        k2, (batch, batch), jnp.float32)
    labels = jnp.arange(batch, dtype=jnp.int32)

    loss = jax.block_until_ready(
        clip_contrastive_loss(logits_per_motion, logits_per_text, labels))
    ref = _reference_loss(logits_per_motion, logits_per_text, labels)
    assert jnp.allclose(loss, ref, atol=1e-5, rtol=1e-5), (loss, ref)

    # Case 2: multi-block grid with a ragged final tile (exercises pipelined
    # row tiling, the two-partition grid, padding mask and the accumulator).
    n2, c2 = 100, 40
    lm2 = jax.random.normal(k3, (n2, c2), jnp.float32) * 2.0
    lt2 = jax.random.normal(k4, (n2, c2), jnp.float32) * 2.0
    labels2 = jax.random.randint(jax.random.PRNGKey(1), (n2,), 0, c2,
                                 dtype=jnp.int32)
    loss2 = jax.block_until_ready(
        clip_contrastive_loss(lm2, lt2, labels2, block_rows=32))
    ref2 = _reference_loss(lm2, lt2, labels2)
    assert jnp.allclose(loss2, ref2, atol=1e-5, rtol=1e-5), (loss2, ref2)

    # Case 3: odd number of row blocks -> one fully-padded (clamped) block on
    # the second partition; its rows must contribute exactly zero.
    n3, c3 = 72, 16
    lm3 = jax.random.normal(k5, (n3, c3), jnp.float32) * 2.0
    lt3 = jax.random.normal(k6, (n3, c3), jnp.float32) * 2.0
    labels3 = jax.random.randint(jax.random.PRNGKey(2), (n3,), 0, c3,
                                 dtype=jnp.int32)
    loss3 = jax.block_until_ready(
        clip_contrastive_loss(lm3, lt3, labels3, block_rows=24))
    ref3 = _reference_loss(lm3, lt3, labels3)
    assert jnp.allclose(loss3, ref3, atol=1e-5, rtol=1e-5), (loss3, ref3)

    # Case 4: bf16 logits (in-kernel f32 upcast path).
    n4, c4 = 64, 48
    lm4 = (jax.random.normal(k3, (n4, c4), jnp.float32) * 2.0).astype(jnp.bfloat16)
    lt4 = (jax.random.normal(k4, (n4, c4), jnp.float32) * 2.0).astype(jnp.bfloat16)
    labels4 = jax.random.randint(jax.random.PRNGKey(3), (n4,), 0, c4,
                                 dtype=jnp.int32)
    loss4 = jax.block_until_ready(
        clip_contrastive_loss(lm4, lt4, labels4, block_rows=16))
    ref4 = _reference_loss(lm4, lt4, labels4)
    assert jnp.allclose(loss4, ref4, atol=1e-4, rtol=1e-4), (loss4, ref4)

    print("KERNEL_OK")
</pallas_src>

<mosaic_0001>
module attributes {stable_mosaic.version = 11 : i64} {
  func.func @_clip_contrastive_kernel(%arg0: i32, %arg1: i32, %arg2: memref<8x8xf32, #tpu.memory_space<vmem>>, %arg3: memref<8x8xf32, #tpu.memory_space<vmem>>, %arg4: memref<8x1xi32, #tpu.memory_space<vmem>>, %arg5: memref<1x8x128xf32, #tpu.memory_space<vmem>>, %arg6: memref<1x1xf32, #tpu.memory_space<vmem>>) attributes {dimension_semantics = [#tpu.dimension_semantics<parallel>, #tpu.dimension_semantics<arbitrary>], iteration_bounds = array<i64: 1, 1>, scalar_prefetch = 0 : i64, scratch_operands = 1 : i64, tpu.core_type = #tpu.core_type<tc>, window_params = [{transform_indices = @transform_0, window_bounds = array<i64: 8, 8>}, {transform_indices = @transform_1, window_bounds = array<i64: 8, 8>}, {transform_indices = @transform_2, window_bounds = array<i64: 8, 1>}, {transform_indices = @transform_3, window_bounds = array<i64: 1, 8, 128>}]} {
    %c0_i32 = arith.constant 0 : i32
    %0 = arith.cmpi eq, %arg1, %c0_i32 : i32
    %1 = arith.extui %0 : i1 to i32
    %c0_i32_0 = arith.constant 0 : i32
    %2 = arith.cmpi ne, %1, %c0_i32_0 : i32
    scf.if %2 {
      %cst_21 = arith.constant 0.000000e+00 : f32
      %48 = vector.broadcast %cst_21 : f32 to vector<1x1xf32>
      %c0_22 = arith.constant 0 : index
      %c0_23 = arith.constant 0 : index
      %49 = vector.load %arg6[%c0_22, %c0_23] : memref<1x1xf32, #tpu.memory_space<vmem>>, vector<1x1xf32>
      tpu.vector_store %arg6[%c0_22, %c0_23], %48 {strides = array<i32>} : memref<1x1xf32, #tpu.memory_space<vmem>>, vector<1x1xf32>,
    } else {
    }
    %c0 = arith.constant 0 : index
    %c0_1 = arith.constant 0 : index
    %3 = vector.load %arg2[%c0, %c0_1] : memref<8x8xf32, #tpu.memory_space<vmem>>, vector<8x8xf32>
    %c0_2 = arith.constant 0 : index
    %c0_3 = arith.constant 0 : index
    %4 = vector.load %arg3[%c0_2, %c0_3] : memref<8x8xf32, #tpu.memory_space<vmem>>, vector<8x8xf32>
    %c0_4 = arith.constant 0 : index
    %c0_5 = arith.constant 0 : index
    %5 = vector.load %arg4[%c0_4, %c0_5] : memref<8x1xi32, #tpu.memory_space<vmem>>, vector<8x1xi32>
    %6 = tpu.iota {dimensions = array<i32: 1>} : vector<8x8xi32>
    %7 = vector.broadcast %5 : vector<8x1xi32> to vector<8x8xi32>
    %8 = arith.cmpi eq, %6, %7 : vector<8x8xi32>
    %c0_6 = arith.constant 0 : index
    %c0_7 = arith.constant 0 : index
    %9 = vector.load %arg6[%c0_6, %c0_7] : memref<1x1xf32, #tpu.memory_space<vmem>>, vector<1x1xf32>
    %cst = arith.constant dense<0xFF800000> : vector<8xf32>
    %10 = vector.multi_reduction <maximumf>, %3, %cst [1] : vector<8x8xf32> to vector<8xf32>
    %11 = vector.shape_cast %10 : vector<8xf32> to vector<8x1xf32>
    %12 = vector.broadcast %11 : vector<8x1xf32> to vector<8x8xf32>
    %13 = arith.subf %3, %12 : vector<8x8xf32>
    %14 = math.exp %13 : vector<8x8xf32>
    %cst_8 = arith.constant dense<0.000000e+00> : vector<8xf32>
    %15 = vector.multi_reduction <add>, %14, %cst_8 [1] : vector<8x8xf32> to vector<8xf32>
    %16 = vector.shape_cast %15 : vector<8xf32> to vector<8x1xf32>
    %17 = math.log %16 : vector<8x1xf32>
    %18 = arith.addf %11, %17 : vector<8x1xf32>
    %cst_9 = arith.constant 0.000000e+00 : f32
    %19 = vector.broadcast %cst_9 : f32 to vector<8x8xf32>
    %20 = arith.select %8, %3, %19 : vector<8x8xi1>, vector<8x8xf32>
    %cst_10 = arith.constant dense<0.000000e+00> : vector<8xf32>
    %21 = vector.multi_reduction <add>, %20, %cst_10 [1] : vector<8x8xf32> to vector<8xf32>
    %22 = vector.shape_cast %21 : vector<8xf32> to vector<8x1xf32>
    %23 = arith.subf %18, %22 : vector<8x1xf32>
    %cst_11 = arith.constant dense<0.000000e+00> : vector<1xf32>
    %24 = vector.multi_reduction <add>, %23, %cst_11 [0] : vector<8x1xf32> to vector<1xf32>
    %25 = vector.shape_cast %24 : vector<1xf32> to vector<1x1xf32>
    %cst_12 = arith.constant dense<0xFF800000> : vector<8xf32>
    %26 = vector.multi_reduction <maximumf>, %4, %cst_12 [1] : vector<8x8xf32> to vector<8xf32>
    %27 = vector.shape_cast %26 : vector<8xf32> to vector<8x1xf32>
    %28 = vector.broadcast %27 : vector<8x1xf32> to vector<8x8xf32>
    %29 = arith.subf %4, %28 : vector<8x8xf32>
    %30 = math.exp %29 : vector<8x8xf32>
    %cst_13 = arith.constant dense<0.000000e+00> : vector<8xf32>
    %31 = vector.multi_reduction <add>, %30, %cst_13 [1] : vector<8x8xf32> to vector<8xf32>
    %32 = vector.shape_cast %31 : vector<8xf32> to vector<8x1xf32>
    %33 = math.log %32 : vector<8x1xf32>
    %34 = arith.addf %27, %33 : vector<8x1xf32>
    %cst_14 = arith.constant 0.000000e+00 : f32
    %35 = vector.broadcast %cst_14 : f32 to vector<8x8xf32>
    %36 = arith.select %8, %4, %35 : vector<8x8xi1>, vector<8x8xf32>
    %cst_15 = arith.constant dense<0.000000e+00> : vector<8xf32>
    %37 = vector.multi_reduction <add>, %36, %cst_15 [1] : vector<8x8xf32> to vector<8xf32>
    %38 = vector.shape_cast %37 : vector<8xf32> to vector<8x1xf32>
    %39 = arith.subf %34, %38 : vector<8x1xf32>
    %cst_16 = arith.constant dense<0.000000e+00> : vector<1xf32>
    %40 = vector.multi_reduction <add>, %39, %cst_16 [0] : vector<8x1xf32> to vector<1xf32>
    %41 = vector.shape_cast %40 : vector<1xf32> to vector<1x1xf32>
    %42 = arith.addf %25, %41 : vector<1x1xf32>
    %43 = arith.addf %9, %42 : vector<1x1xf32>
    %c0_17 = arith.constant 0 : index
    %c0_18 = arith.constant 0 : index
    %44 = vector.load %arg6[%c0_17, %c0_18] : memref<1x1xf32, #tpu.memory_space<vmem>>, vector<1x1xf32>
    tpu.vector_store %arg6[%c0_17, %c0_18], %43 {strides = array<i32>} : memref<1x1xf32, #tpu.memory_space<vmem>>, vector<1x1xf32>,
    %c0_i32_19 = arith.constant 0 : i32
    %45 = arith.cmpi eq, %arg1, %c0_i32_19 : i32
    %46 = arith.extui %45 : i1 to i32
    %c0_i32_20 = arith.constant 0 : i32
    %47 = arith.cmpi ne, %46, %c0_i32_20 : i32
    scf.if %47 {
      %c0_21 = arith.constant 0 : index
      %c0_22 = arith.constant 0 : index
      %48 = vector.load %arg6[%c0_21, %c0_22] : memref<1x1xf32, #tpu.memory_space<vmem>>, vector<1x1xf32>
      %49 = vector.shape_cast %48 : vector<1x1xf32> to vector<1x1x1xf32>
      %50 = vector.shape_cast %49 : vector<1x1x1xf32> to vector<1x1x1xf32>
      %51 = vector.broadcast %50 : vector<1x1x1xf32> to vector<1x8x128xf32>
      %c0_23 = arith.constant 0 : index
      %c0_24 = arith.constant 0 : index
      %c0_25 = arith.constant 0 : index
      %52 = vector.load %arg5[%c0_23, %c0_24, %c0_25] : memref<1x8x128xf32, #tpu.memory_space<vmem>>, vector<1x8x128xf32>
      tpu.vector_store %arg5[%c0_23, %c0_24, %c0_25], %51 {strides = array<i32>} : memref<1x8x128xf32, #tpu.memory_space<vmem>>, vector<1x8x128xf32>,
    } else {
    }
    return
  }
  func.func @transform_0(%arg0: i32, %arg1: i32) -> (i32, i32) {
    %c1_i32 = arith.constant 1 : i32
    %0 = arith.muli %arg0, %c1_i32 : i32
    %1 = arith.addi %0, %arg1 : i32
    %c0_i32 = arith.constant 0 : i32
    %2 = arith.minsi %1, %c0_i32 : i32
    %c0_i32_0 = arith.constant 0 : i32
    %c0_i32_1 = arith.constant 0 : i32
    return %2, %c0_i32_0 : i32, i32
  }
  func.func @transform_1(%arg0: i32, %arg1: i32) -> (i32, i32) {
    %c1_i32 = arith.constant 1 : i32
    %0 = arith.muli %arg0, %c1_i32 : i32
    %1 = arith.addi %0, %arg1 : i32
    %c0_i32 = arith.constant 0 : i32
    %2 = arith.minsi %1, %c0_i32 : i32
    %c0_i32_0 = arith.constant 0 : i32
    %c0_i32_1 = arith.constant 0 : i32
    return %2, %c0_i32_0 : i32, i32
  }
  func.func @transform_2(%arg0: i32, %arg1: i32) -> (i32, i32) {
    %c1_i32 = arith.constant 1 : i32
    %0 = arith.muli %arg0, %c1_i32 : i32
    %1 = arith.addi %0, %arg1 : i32
    %c0_i32 = arith.constant 0 : i32
    %c0_i32_0 = arith.constant 0 : i32
    return %1, %c0_i32 : i32, i32
  }
  func.func @transform_3(%arg0: i32, %arg1: i32) -> (i32, i32, i32) {
    %c0_i32 = arith.constant 0 : i32
    %c0_i32_0 = arith.constant 0 : i32
    %c0_i32_1 = arith.constant 0 : i32
    return %arg0, %c0_i32, %c0_i32_0 : i32, i32, i32
  }
}

</mosaic_0001>

<bundles_post_ra>
// kernel: tpu_custom_call.1
= control target key start
LH: loop header
LB: loop body
LE: loop exit
PB: predicated region body
PF: predicated region fallthrough
CT: control target
= control target key end

     0   :  { %8 = vsyncpa [#allocation4], 0  ;;  %s292_s0 = inlined_call_operand.vmem [shape: f32[8,8], index: 0, kind: input, shape index: {}]   ;;  %s293_s1 = inlined_call_operand.hbm [shape: f32[8,8], index: 1, kind: input, shape index: {}]   ;;  %s294_s2 = inlined_call_operand.vmem [shape: s32[8,1], index: 2, kind: input, shape index: {}]   ;;  %s295_s3 = inlined_call_operand.hbm [shape: f32[1,8,128], index: 3, kind: output, shape index: {}]  }
   0x1   :  { %9 = vsyncpa [#allocation5], 0  ;;  %s248_s12 = smov [#allocation3]  }
   0x2   :  { %s33_s13 = sshll.u32 %s248_s12, 4  ;;  %s34_s13 = int_to_ptr.vmem [resolvable:$true] %s33_s13 }
   0x3   :  { %s212_s14 = scalar_lea.vmem %s34_s13, 128  ;;  %p217_p1 = scmp.lt.s32.totalorder %s34_s13, %s34_s13 }
   0x4   :  { %p213_p0 = scmp.ne.s32.totalorder %s34_s13, %s212_s14  ;;  %p218_p2 = scmp.lt.s32.totalorder %s212_s14, %s212_s14 }
   0x6   :  { %p219_p3 = por %p218_p2, %p217_p1 }
   0x8   :  { %p220_p4 = pnand %p219_p3, %p213_p0 }
   0xa   :  { %223 = shalt.err (!%p220_p4)
}
   0xb   :  { %36 = dma.hbm_to_vmem [thread:$0]  %s293_s1, 128, %s34_s13, [#allocation4]  }
   0xc   :  { %244 = dma.done.wait [#allocation4], 128  }
   0xd   :  { %245 = vsyncadd [#allocation4], 4294967168  ;;  %vm83_vm0 = vcmask 0   ;;  %v249_v0 = vmov 0.0   ;;  %v250_v1 = vmov 0   ;;  %vm95_vm1 = vcmask 64512  }
   0xe   :  { %84 = vst.msk [vmem:[#allocation2] sm:$0x1] %vm83_vm0, %v249_v0  ;;  %194 = vset.pattern.permute.xlu1 %v250_v1  ;;  %195 = vset.pattern.permute.xlu0 %v250_v1  ;;  %v85_v2 = vld [vmem:[%s292_s0] sm:$0xff]  ;;  %v88_v13 = vlaneseq  ;;  %s251_s0 = smov [#allocation6]  }
   0xf   :  { %v86_v3 = vld [vmem:[#allocation3] sm:$0xff]  ;;  %v96_v5 = vsel %vm95_vm1, %v85_v2, -inf  ;;  %s166_s1 = sshll.u32 %s251_s0, 4  ;;  %s167_s1 = int_to_ptr.vmem [resolvable:$true] %s166_s1 }
  0x10   :  { %v87_v4 = vld [vmem:[%s294_s2] sm:$0xff]  ;;  %97 = vmax.xlane.f32.xlu0 %v96_v5  ;;  %v119_v6 = vsel %vm95_vm1, %v86_v3, -inf  ;;  %v89_v14 = vand.u32 127, %v88_v13  ;;  %s224_s2 = scalar_lea.vmem %s167_s1, 128  ;;  %p229_p6 = scmp.lt.s32.totalorder %s167_s1, %s167_s1 }
  0x11   :  { %91 = vperm.xlu1 %194, %v87_v4   ;;  %p225_p5 = scmp.ne.s32.totalorder %s167_s1, %s224_s2  ;;  %p230_p7 = scmp.lt.s32.totalorder %s224_s2, %s224_s2 }
  0x13   :  { %p231_p8 = por %p230_p7, %p229_p6 }
  0x14   :  { %120 = vmax.xlane.f32.xlu0 %v119_v6 }
  0x15   :  { %v94_v48 = vld [vmem:[#allocation2] sm:$0x1]  ;;  %p232_p9 = pnand %p231_p8, %p225_p5 }
  0x8c   :  { %v92_v15 = vpop.permute.xlu1 %91 }
  0x8d   :  { %vm93_vm2 = vcmp.eq.s32.totalorder %v89_v14, %v92_v15 }
  0x8e   :  { %v108_v19 = vsel %vm93_vm2, %v85_v2, 0.0  ;;  %v131_v22 = vsel %vm93_vm2, %v86_v3, 0.0 }
  0x8f   :  { %v109_v21 = vsel %vm95_vm1, %v108_v19, 0.0  ;;  %v132_v23 = vsel %vm95_vm1, %v131_v22, 0.0 }
  0x99   :  { %v98_v7 = vpop.xlane.xlu0 %97 }
  0x9a   :  { %v99_v8 = vsub.f32 %v85_v2, %v98_v7 }
  0x9c   :  { %v100_v9 = vmul.f32 1.442695, %v99_v8 }
  0x9d   :  { %v121_v10 = vpop.xlane.xlu0 %120 }
  0x9e   :  { %196 = vpow2.f32 %v100_v9  ;;  %v122_v11 = vsub.f32 %v86_v3, %v121_v10 }
  0xa0   :  { %v123_v12 = vmul.f32 1.442695, %v122_v11 }
  0xa2   :  { %198 = vpow2.f32 %v123_v12 }
  0xab   :  { %v197_v16 = vpop.eup %196 }
  0xac   :  { %v102_v17 = vsel %vm95_vm1, %v197_v16, 0.0 }
  0xad   :  { %103 = vadd.xlane.f32.xlu1 %v102_v17 }
  0xaf   :  { %v199_v18 = vpop.eup %198 }
  0xb0   :  { %v125_v20 = vsel %vm95_vm1, %v199_v18, 0.0 }
  0xb1   :  { %126 = vadd.xlane.f32.xlu0 %v125_v20 }
  0xb5   :  { %110 = vadd.xlane.f32.xlu0 %v109_v21 }
  0xb9   :  { %133 = vadd.xlane.f32.xlu0 %v132_v23 }
 0x136   :  { %v104_v24 = vpop.xlane.xlu1 %103 }
 0x137   :  { %200 = vlog2.f32 %v104_v24 }
 0x13a   :  { %v127_v25 = vpop.xlane.xlu0 %126 }
 0x13b   :  { %202 = vlog2.f32 %v127_v25 }
 0x13e   :  { %v111_v28 = vpop.xlane.xlu0 %110 }
 0x142   :  { %v134_v35 = vpop.xlane.xlu0 %133 }
 0x144   :  { %v201_v26 = vpop.eup %200 }
 0x145   :  { %v106_v27 = vmul.f32 0.6931472, %v201_v26 }
 0x147   :  { %v107_v29 = vadd.f32 %v106_v27, %v98_v7 }
 0x148   :  { %v203_v30 = vpop.eup %202 }
 0x149   :  { %v129_v31 = vmul.f32 0.6931472, %v203_v30  ;;  %v112_v32 = vsub.f32 %v107_v29, %v111_v28 }
 0x14b   :  { %v113_v33 = vrot.slane %v112_v32, 4  ;;  %v130_v34 = vadd.f32 %v129_v31, %v121_v10 }
 0x14d   :  { %v114_v36 = vadd.f32 %v113_v33, %v112_v32  ;;  %v135_v37 = vsub.f32 %v130_v34, %v134_v35 }
 0x14f   :  { %v115_v38 = vrot.slane %v114_v36, 2  ;;  %v136_v39 = vrot.slane %v135_v37, 4 }
 0x151   :  { %v116_v40 = vadd.f32 %v115_v38, %v114_v36  ;;  %v137_v41 = vadd.f32 %v136_v39, %v135_v37 }
 0x153   :  { %v138_v42 = vrot.slane %v137_v41, 2  ;;  %v117_v43 = vrot.slane %v116_v40, 1 }
 0x155   :  { %v139_v44 = vadd.f32 %v138_v42, %v137_v41  ;;  %v118_v46 = vadd.f32 %v117_v43, %v116_v40 }
 0x157   :  { %v140_v45 = vrot.slane %v139_v44, 1 }
 0x159   :  { %v141_v47 = vadd.f32 %v140_v45, %v139_v44 }
 0x15b   :  { %v142_v49 = vadd.f32 %v141_v47, %v118_v46 }
 0x15d   :  { %v143_v50 = vadd.f32 %v142_v49, %v94_v48 }
 0x15f   :  { %145 = vst.msk [vmem:[#allocation2] sm:$0x1] %vm83_vm0, %v143_v50 }
 0x166   :  { %v189_v51 = vld [vmem:[#allocation2] ss:$0 sm:$0xff] }
 0x167   :  { %156 = vperm.xlu0 %195, %v189_v51  }
 0x1e2   :  { %v157_v52 = vpop.permute.xlu0 %156 }
 0x1e3   :  { %159 = vst [vmem:[#allocation6] sm:$0xff] %v157_v52 }
 0x1e4   :  { %235 = shalt.err (!%p232_p9)
}
 0x1e5   :  { %169 = dma.vmem_to_hbm [thread:$0]  %s167_s1, 128, %s295_s3, [#allocation5]  }
 0x1e6   :  { %246 = dma.done.wait [#allocation5], 128  }
 0x1e7   :  { %247 = vsyncadd [#allocation5], 4294967168 }
 0x1e8   :  { %173 = vsyncpa [#allocation4], 1 }
 0x1e9   :  { %174 = vsyncpa [#allocation5], 1 }

</bundles_post_ra>
